<compile_context>
chip_gen: v7x
topology: tpu7x:2x2x1
jax: 0.10.0
libtpu: 0.0.40
codegen_flags: <defaults>
</compile_context>

<pallas_src>
import jax
import jax.numpy as jnp
from jax.experimental import pallas as pl
from jax.experimental.pallas import tpu as pltpu


def _ffn_kernel(x_ref, w1_ref, b1_ref, w2_ref, b2_ref, o_ref):
    # x_ref: (tm, H) input dtype; w*_ref: (H, H) in (in, out) layout, compute dtype;
    # b*_ref: (1, H) f32; o_ref: (tm, H) input dtype.
    x = x_ref[...]
    xm = x.astype(w1_ref.dtype)

    # First matmul on the MXU with f32 accumulation.
    h = jnp.dot(xm, w1_ref[...], preferred_element_type=jnp.float32)
    # Bias + ReLU fused in f32 (implicit (1,H) -> (tm,H) broadcast).
    h = jnp.maximum(h + b1_ref[...], 0.0)
    # Cast back to the MXU operand dtype for the second matmul.
    h = h.astype(w2_ref.dtype)

    y = jnp.dot(h, w2_ref[...], preferred_element_type=jnp.float32)
    # Bias + residual in f32, single cast to the output dtype.
    y = y + b2_ref[...] + x.astype(jnp.float32)
    o_ref[...] = y.astype(o_ref.dtype)


def pointwise_feedforward(x, w1, b1, w2, b2, *, matmul_dtype=None):
    """x: (B, L, H); w1/w2: Conv1d weights of shape (H, H, 1); b1/b2: (H,).

    matmul_dtype: optionally cast MXU operands (weights + the x copy fed to the
    matmuls) to e.g. jnp.bfloat16; epilogue and output stay in the input dtype.
    """
    B, L, H = x.shape
    M = B * L
    dtype = x.dtype
    compute_dtype = jnp.dtype(matmul_dtype) if matmul_dtype is not None else jnp.dtype(dtype)

    itemsize = jnp.dtype(dtype).itemsize
    w_itemsize = compute_dtype.itemsize
    # Minimum legal sublane extent for a partial (non-full-dim) row block.
    row_align = {1: 32, 2: 16}.get(itemsize, 8)

    # ---- Per-generation VMEM cap. ----
    try:
        vmem_capacity = int(pltpu.get_tpu_info().vmem_capacity_bytes)
    except Exception:
        vmem_capacity = 64 << 20                   # conservative fallback (v7x per-TC)
    vmem_cap = min((vmem_capacity * 3) // 4, 100 << 20)

    # ---- VMEM accounting. ----
    # Weights budgeted at 2x (worst-case double-buffering) even though the constant
    # index_map keeps them resident; biases are negligible.
    fixed_bytes = 2 * 2 * H * H * w_itemsize + 2 * 2 * H * 4
    # Per row: x + out tiles double-buffered (input dtype) plus the in-kernel f32
    # intermediates h / y that Mosaic materializes as scratch.
    per_row_bytes = 2 * H * itemsize + 2 * H * itemsize + 2 * H * 4

    # ---- Row tile: ~4 MiB of x per grid step, bounded by VMEM budget and by M. ----
    tm_traffic = max(512, (4 << 20) // max(1, H * itemsize))
    tm_vmem = max(row_align, (vmem_cap // 2 - fixed_bytes) // max(1, per_row_bytes))
    tm = min(tm_traffic, tm_vmem)
    tm = max(row_align, (tm // row_align) * row_align)
    if tm >= M:
        tm = M                                      # full-extent block (always legal)
        if M >= 2 * row_align:
            # Keep >=2 grid steps so v7x's two TensorCores both get work.
            tm = ((-(-M // 2) + row_align - 1) // row_align) * row_align

    grid_m = -(-M // tm)                            # ragged tail handled by Pallas

    vmem_est = fixed_bytes + tm * per_row_bytes
    vmem_limit = int(min(max(2 * vmem_est, 32 << 20), vmem_cap))

    # ---- Flatten rows (no copy) and build dense (in, out)-layout weights. ----
    # Conv1d(kernel_size=1): out[o] = sum_i W[o, i, 0] * in[i] + b[o]
    #   => dense matmul with weight W[:, :, 0]^T.
    xf = x.reshape(M, H)
    w1_io = jnp.transpose(w1[:, :, 0]).astype(compute_dtype)
    w2_io = jnp.transpose(w2[:, :, 0]).astype(compute_dtype)
    b1_2d = b1.astype(jnp.float32).reshape(1, H)
    b2_2d = b2.astype(jnp.float32).reshape(1, H)

    cost = pl.CostEstimate(
        flops=4 * M * H * H,
        transcendentals=0,
        bytes_accessed=2 * M * H * itemsize + 2 * H * H * w_itemsize + 2 * H * 4,
    )

    out = pl.pallas_call(
        _ffn_kernel,
        out_shape=jax.ShapeDtypeStruct((M, H), dtype),
        grid_spec=pltpu.PrefetchScalarGridSpec(
            num_scalar_prefetch=0,
            grid=(grid_m,),
            in_specs=[
                pl.BlockSpec((tm, H), lambda i: (i, 0)),   # x rows
                pl.BlockSpec((H, H), lambda i: (0, 0)),    # W1 (in,out), resident
                pl.BlockSpec((1, H), lambda i: (0, 0)),    # b1, resident
                pl.BlockSpec((H, H), lambda i: (0, 0)),    # W2 (in,out), resident
                pl.BlockSpec((1, H), lambda i: (0, 0)),    # b2, resident
            ],
            out_specs=pl.BlockSpec((tm, H), lambda i: (i, 0)),
        ),
        compiler_params=pltpu.CompilerParams(
            dimension_semantics=("parallel",),
            vmem_limit_bytes=vmem_limit),
        cost_estimate=cost,
    )(xf, w1_io, b1_2d, w2_io, b2_2d)

    return out.reshape(B, L, H)


def _reference(x, w1, b1, w2, b2):
    # Pure-JAX reference reproducing the PyTorch forward (dropout = identity).
    xt = jnp.swapaxes(x, -1, -2)                                 # (B, H, L)
    h = jnp.einsum('oi,bil->bol', w1[:, :, 0], xt) + b1[None, :, None]
    h = jnp.maximum(h, 0.0)
    y = jnp.einsum('oi,bil->bol', w2[:, :, 0], h) + b2[None, :, None]
    return jnp.swapaxes(y, -1, -2) + x


if __name__ == "__main__":
    # SASRec-like small shapes; L*B chosen so the row grid has a ragged tail block
    # and H=50 exercises the non-128-multiple full-extent lane dim.
    B, L, H = 2, 9, 50
    key = jax.random.PRNGKey(0)
    kx, k1, k2, k3, k4 = jax.random.split(key, 5)

    x = jax.random.normal(kx, (B, L, H), dtype=jnp.float32)
    # Deterministic parameter init (Conv1d weight shape: (out, in, 1), bias: (out,)).
    bound = 1.0 / jnp.sqrt(H * 1.0)
    w1 = jax.random.uniform(k1, (H, H, 1), jnp.float32, -bound, bound)
    b1 = jax.random.uniform(k2, (H,), jnp.float32, -bound, bound)
    w2 = jax.random.uniform(k3, (H, H, 1), jnp.float32, -bound, bound)
    b2 = jax.random.uniform(k4, (H,), jnp.float32, -bound, bound)

    out = jax.block_until_ready(pointwise_feedforward(x, w1, b1, w2, b2))

    ref = _reference(x, w1, b1, w2, b2)
    assert out.shape == (B, L, H)
    # f32 inputs -> f32 MXU operands (f32 accumulation); bf16 matmul_dtype would
    # need a looser tolerance.
    assert jnp.allclose(out, ref, atol=2e-5, rtol=2e-5), "mismatch vs reference"
    print("KERNEL_OK")
</pallas_src>

<mosaic_0001>
module attributes {stable_mosaic.version = 11 : i64} {
  func.func @_ffn_kernel(%arg0: i32, %arg1: memref<16x50xf32, #tpu.memory_space<vmem>>, %arg2: memref<50x50xf32, #tpu.memory_space<vmem>>, %arg3: memref<1x50xf32, #tpu.memory_space<vmem>>, %arg4: memref<50x50xf32, #tpu.memory_space<vmem>>, %arg5: memref<1x50xf32, #tpu.memory_space<vmem>>, %arg6: memref<16x50xf32, #tpu.memory_space<vmem>>) attributes {dimension_semantics = [#tpu.dimension_semantics<parallel>], iteration_bounds = array<i64: 2>, scalar_prefetch = 0 : i64, scratch_operands = 0 : i64, tpu.core_type = #tpu.core_type<tc>, window_params = [{transform_indices = @transform_0, window_bounds = array<i64: 16, 50>}, {pipeline_mode = #tpu.pipeline_mode<synchronous>, transform_indices = @transform_1, window_bounds = array<i64: 50, 50>}, {pipeline_mode = #tpu.pipeline_mode<synchronous>, transform_indices = @transform_2, window_bounds = array<i64: 1, 50>}, {pipeline_mode = #tpu.pipeline_mode<synchronous>, transform_indices = @transform_3, window_bounds = array<i64: 50, 50>}, {pipeline_mode = #tpu.pipeline_mode<synchronous>, transform_indices = @transform_4, window_bounds = array<i64: 1, 50>}, {transform_indices = @transform_5, window_bounds = array<i64: 16, 50>}]} {
    %c0 = arith.constant 0 : index
    %c0_0 = arith.constant 0 : index
    %0 = vector.load %arg1[%c0, %c0_0] : memref<16x50xf32, #tpu.memory_space<vmem>>, vector<16x50xf32>
    %c0_1 = arith.constant 0 : index
    %c0_2 = arith.constant 0 : index
    %1 = vector.load %arg2[%c0_1, %c0_2] : memref<50x50xf32, #tpu.memory_space<vmem>>, vector<50x50xf32>
    %cst = arith.constant dense<0.000000e+00> : vector<16x50xf32>
    %2 = tpu.matmul %0, %1, %cst {dimension_numbers = #tpu.dot_dimension_numbers<[1], [0], [0], [1], [0, 0, 1, 1], [], []>} : vector<16x50xf32>, vector<50x50xf32>, vector<16x50xf32> -> vector<16x50xf32>
    %c0_3 = arith.constant 0 : index
    %c0_4 = arith.constant 0 : index
    %3 = vector.load %arg3[%c0_3, %c0_4] : memref<1x50xf32, #tpu.memory_space<vmem>>, vector<1x50xf32>
    %4 = vector.broadcast %3 : vector<1x50xf32> to vector<16x50xf32>
    %5 = arith.addf %2, %4 : vector<16x50xf32>
    %cst_5 = arith.constant 0.000000e+00 : f32
    %6 = vector.broadcast %cst_5 : f32 to vector<16x50xf32>
    %7 = arith.maximumf %5, %6 : vector<16x50xf32>
    %c0_6 = arith.constant 0 : index
    %c0_7 = arith.constant 0 : index
    %8 = vector.load %arg4[%c0_6, %c0_7] : memref<50x50xf32, #tpu.memory_space<vmem>>, vector<50x50xf32>
    %cst_8 = arith.constant dense<0.000000e+00> : vector<16x50xf32>
    %9 = tpu.matmul %7, %8, %cst_8 {dimension_numbers = #tpu.dot_dimension_numbers<[1], [0], [0], [1], [0, 0, 1, 1], [], []>} : vector<16x50xf32>, vector<50x50xf32>, vector<16x50xf32> -> vector<16x50xf32>
    %c0_9 = arith.constant 0 : index
    %c0_10 = arith.constant 0 : index
    %10 = vector.load %arg5[%c0_9, %c0_10] : memref<1x50xf32, #tpu.memory_space<vmem>>, vector<1x50xf32>
    %11 = vector.broadcast %10 : vector<1x50xf32> to vector<16x50xf32>
    %12 = arith.addf %9, %11 : vector<16x50xf32>
    %13 = arith.addf %12, %0 : vector<16x50xf32>
    %c0_11 = arith.constant 0 : index
    %c0_12 = arith.constant 0 : index
    %14 = vector.load %arg6[%c0_11, %c0_12] : memref<16x50xf32, #tpu.memory_space<vmem>>, vector<16x50xf32>
    tpu.vector_store %arg6[%c0_11, %c0_12], %13 {strides = array<i32>} : memref<16x50xf32, #tpu.memory_space<vmem>>, vector<16x50xf32>,
    return
  }
  func.func @transform_0(%arg0: i32) -> (i32, i32) {
    %c0_i32 = arith.constant 0 : i32
    %c0_i32_0 = arith.constant 0 : i32
    return %arg0, %c0_i32 : i32, i32
  }
  func.func @transform_1(%arg0: i32) -> (i32, i32) {
    %c0_i32 = arith.constant 0 : i32
    %c0_i32_0 = arith.constant 0 : i32
    %c0_i32_1 = arith.constant 0 : i32
    return %c0_i32, %c0_i32_0 : i32, i32
  }
  func.func @transform_2(%arg0: i32) -> (i32, i32) {
    %c0_i32 = arith.constant 0 : i32
    %c0_i32_0 = arith.constant 0 : i32
    %c0_i32_1 = arith.constant 0 : i32
    return %c0_i32, %c0_i32_0 : i32, i32
  }
  func.func @transform_3(%arg0: i32) -> (i32, i32) {
    %c0_i32 = arith.constant 0 : i32
    %c0_i32_0 = arith.constant 0 : i32
    %c0_i32_1 = arith.constant 0 : i32
    return %c0_i32, %c0_i32_0 : i32, i32
  }
  func.func @transform_4(%arg0: i32) -> (i32, i32) {
    %c0_i32 = arith.constant 0 : i32
    %c0_i32_0 = arith.constant 0 : i32
    %c0_i32_1 = arith.constant 0 : i32
    return %c0_i32, %c0_i32_0 : i32, i32
  }
  func.func @transform_5(%arg0: i32) -> (i32, i32) {
    %c0_i32 = arith.constant 0 : i32
    %c0_i32_0 = arith.constant 0 : i32
    return %arg0, %c0_i32 : i32, i32
  }
}

</mosaic_0001>

<bundles_post_ra>
// kernel: tpu_custom_call.1
= control target key start
LH: loop header
LB: loop body
LE: loop exit
PB: predicated region body
PF: predicated region fallthrough
CT: control target
= control target key end

     0   :  { %10 = vsyncpa [#allocation3], 0  ;;  %s1245_s0 = inlined_call_operand.hbm [shape: f32[18,50], index: 0, kind: input, shape index: {}]   ;;  %s1246_s1 = inlined_call_operand.hbm [shape: f32[50,50], index: 1, kind: input, shape index: {}]   ;;  %s1247_s2 = inlined_call_operand.vmem [shape: f32[1,50], index: 2, kind: input, shape index: {}]   ;;  %s1248_s3 = inlined_call_operand.hbm [shape: f32[50,50], index: 3, kind: input, shape index: {}]   ;;  %s1249_s4 = inlined_call_operand.vmem [shape: f32[1,50], index: 4, kind: input, shape index: {}]   ;;  %s1250_s5 = inlined_call_operand.hbm [shape: f32[18,50], index: 5, kind: output, shape index: {}]  }
   0x1   :  { %12 = vsyncpa [#allocation3 + $0x1], 0 }
   0x2   :  { %13 = vsyncpa [#allocation6], 0 }
   0x3   :  { %14 = vsyncpa [#allocation4], 0 }
   0x4   :  { %16 = vsyncpa [#allocation4 + $0x1], 0  ;;  %s980_s18 = smov 0   ;;  %s982_s19 = smov 0  }
   0x5   :  { %s984_s20 = smov 0   ;;  %s986_s21 = smov 0  }
   0x6 LB: > { %s1001_s22 = sadd.s32 4294967295, %s938_s21   ;;  %s606_s23 = sadd.s32 4294967294, %s938_s21   ;;  %s938_s21 = sphi %s986_s21, %s1272_s21   ;;  %s934_s20 = sphi %s984_s20, %s1271_s20   ;;  %s930_s19 = sphi %s982_s19, %s1270_s19   ;;  %s926_s18 = sphi %s980_s18, %s1269_s18  }
   0x7   : > { %s1005_s24 = sadd.s32 1, %s938_s21   ;;  %s29_s25 = sadd.s32 1, %s934_s20 }
   0x8   : > { %s26_s26 = ssub.s32 %s938_s21, %s1005_s24  ;;  %p36_p0 = scmp.ne.s32.totalorder %s934_s20, %s930_s19 }
   0x9   : > { %p27_p1 = scmp.eq.s32.totalorder %s26_s26, 0  ;;  %p37_p2 = scmp.eq.s32.totalorder %s938_s21, 0 }
   0xa   : > { %p42_p3 = scmp.ne.s32.totalorder %s930_s19, %s926_s18  ;;  %p1251_p4 = scmp.eq.s32.totalorder %s1001_s22, 0 }
   0xb   : > { %s1017_s27 = scalar_select %p27_p1, %s934_s20, %s29_s25  }
   0xc   : > { %p1019_p5 = por %p37_p2, %p36_p0  ;;  %p1025_p6 = por %p1251_p4, %p42_p3 }
   0xd   : > { %1254 = sst [smem:[#allocation12_spill]] %s1017_s27  ;;  %p150_p7 = scmp.eq.s32.totalorder %s1001_s22, 1 }
   0xe   : > { %s1255_s28 = scalar_select %p1019_p5, 1, 0 }
   0xf   : > { %s1256_s29 = scalar_select %p1025_p6, 1, 0 }
  0x10   : > { %p156_p8 = scmp.eq.s32.totalorder %s606_s23, 1  ;;  %p607_p9 = scmp.ge.s32.totalorder %s938_s21, 1 }
  0x11   : > { %p163_p10 = scmp.lt.s32.totalorder %s938_s21, 3  ;;  %p1032_p11 = por %p150_p7, %p36_p0 }
  0x12   : > { %p1036_p12 = por %p156_p8, %p42_p3  ;;  %s940_s8 = smov [#allocation5]  }
  0x13   : > { %s1257_s30 = scalar_select %p1032_p11, 1, 0 }
  0x14   : > { %s1258_s6 = scalar_select %p1036_p12, 1, 0 }
  0x15   : > { %p1040_p13 = pnand %p607_p9, %p163_p10  ;;  %s175_s9 = sshll.u32 %s940_s8, 4  ;;  %s176_s9 = int_to_ptr.vmem [resolvable:$true] %s175_s9 }
  0x16   : > { %s941_s11 = smov [#allocation7]   ;;  %s784_s15 = scalar_lea.hbm %s1246_s1, 896 }
  0x17   : > { %s1259_s7 = scalar_select %p1040_p13, 1, 0 }
  0x18   : > { %p728_p1 = pneg %p1040_p13  ;;  %s191_s12 = sshll.u32 %s941_s11, 4  ;;  %s1052_s12 = int_to_ptr.vmem [resolvable:$true] %s191_s12 }
  0x19   : > { %p785_p0 = scmp.ne.s32.totalorder %s1246_s1, %s784_s15  ;;  %p791_p9 = scmp.lt.u32.totalorder %s784_s15, %s1246_s1 }
  0x1a   : > { %p1048_p2 = pnand %p728_p1, %p1251_p4 }
  0x1c   : > { %p786_p3 = pneg %p1048_p2 }
  0x1e   : > { %p787_p7 = pnand %p786_p3, %p785_p0 }
  0x20   : > { %p788_p8 = pneg %p787_p7 }
  0x22   : > { %p793_p10 = pnand %p791_p9, %p788_p8 }
  0x24   : > { %796 = shalt.err (!%p793_p10)
}
  0x25   : > { %s797_s26 = scalar_lea.vmem %s176_s9, 896  ;;  %p805_p11 = scmp.lt.s32.totalorder %s176_s9, %s176_s9 }
  0x26   : > { %p798_p1 = scmp.ne.s32.totalorder %s176_s9, %s797_s26  ;;  %p806_p6 = scmp.lt.s32.totalorder %s797_s26, %s797_s26 }
  0x28   : > { %p800_p4 = pnand %p798_p1, %p786_p3  ;;  %p807_p13 = por %p806_p6, %p805_p11 }
  0x2a   : > { %p801_p12 = pneg %p800_p4 }
  0x2c   : > { %p808_p5 = pnand %p807_p13, %p801_p12 }
  0x2e   : > { %811 = shalt.err (!%p808_p5)
}
  0x2f   : > { %s942_s8 = smov 128   ;;  %s943_s11 = smov 8  }
  0x30   : > { %731 = dma.hbm_to_vmem [thread:$0]  (!%p1048_p2), %s1246_s1, 896, %s176_s9, [#allocation6], %s942_s8, %s942_s8, %s943_s11  }
  0x31   : > { %s812_s17 = scalar_lea.hbm %s1248_s3, 896 }
  0x32   : > { %p813_p4 = scmp.ne.s32.totalorder %s1248_s3, %s812_s17  ;;  %p819_p11 = scmp.lt.u32.totalorder %s812_s17, %s1248_s3 }
  0x34   : > { %p815_p5 = pnand %p813_p4, %p786_p3 }
  0x36   : > { %p816_p6 = pneg %p815_p5 }
  0x38   : > { %p821_p12 = pnand %p819_p11, %p816_p6 }
  0x3a   : > { %824 = shalt.err (!%p821_p12)
}
  0x3b   : > { %s825_s9 = scalar_lea.vmem %s1052_s12, 896  ;;  %p833_p8 = scmp.lt.s32.totalorder %s1052_s12, %s1052_s12 }
  0x3c   : > { %p826_p13 = scmp.ne.s32.totalorder %s1052_s12, %s825_s9  ;;  %p834_p9 = scmp.lt.s32.totalorder %s825_s9, %s825_s9 }
  0x3e   : > { %p828_p0 = pnand %p826_p13, %p786_p3  ;;  %p835_p10 = por %p834_p9, %p833_p8 }
  0x40   : > { %p829_p7 = pneg %p828_p0 }
  0x42   : > { %p836_p1 = pnand %p835_p10, %p829_p7 }
  0x44   : > { %839 = shalt.err (!%p836_p1)
}
  0x45   : > { %734 = dma.hbm_to_vmem [thread:$0]  (!%p1048_p2), %s1248_s3, 896, %s1052_s12, [#allocation6], %s942_s8, %s942_s8, %s943_s11  }
  0x46   : > { %p610_p4 = scmp.ge.s32.totalorder %s938_s21, 2 }
  0x47   : > { %p1261_p3 = scmp.ne.s32.totalorder (!%p610_p4), %s1255_s28, 0 }
  0x48   : > { %204 = sbr.rel (%p610_p4) target bundleno = 114 (0x72), region = 32 }
  0x4f   : > { %207 = sbr.rel (!%p1261_p3) target bundleno = 114 (0x72), region = 36  ;;  %s208_s14 = sand.u32 (%p1261_p3), 1, %s934_s20  }
  0x50   : > { %s612_s15 = sshll.u32 (%p1261_p3), %s938_s21, 1  ;;  %s611_s16 = sshll.u32 (%p1261_p3), %s208_s14, 4 }
  0x51   : > { %s214_s17 = ssub.s32 (%p1261_p3), 3, %s612_s15  ;;  %s1111_s8 = scalar_lea.sflag (%p1261_p3), [#allocation3], %s208_s14 }
  0x52   : > { %p215_p5 = scmp.lt.s32.totalorder (%p1261_p3), %s214_s17, 2  ;;  %s212_s11 = scalar_lea.vmem (%p1261_p3), [#allocation2], %s611_s16 }
  0x56   : > { %s1274_s17 = smov (!%p215_p5, %s214_s17), 2 }
  0x57   : > { %s1108_s10 = sshll.u32 %s1274_s17, 7 }
  0x58   : > { %s219_s12 = ssub.s32 256, %s1108_s10 }
  0x59   : > { %220 = vsyncadd %s1111_s8, %s219_s12  ;;  %p614_p2 = scmp.ne.s32.totalorder %s1108_s10, 0  ;;  %s640_s28 = sshll.u32 %s938_s21, 8 }
  0x5a   : > { %s1119_s26 = scalar_lea.hbm %s1245_s0, %s640_s28  ;;  %s225_s9 = sshll.u32 %s212_s11, 4  ;;  %s1121_s9 = int_to_ptr.vmem [resolvable:$true] %s225_s9 }
  0x5b   : > { %s840_s27 = scalar_lea.hbm %s1119_s26, %s1108_s10  ;;  %s844_s15 = scalar_lea.hbm %s1245_s0, 384 }
  0x5c   : > { %p841_p6 = scmp.ne.s32.totalorder %s1119_s26, %s840_s27  ;;  %p845_p13 = scmp.lt.u32.totalorder %s1119_s26, %s1245_s0 }
  0x5d   : > { %p846_p0 = scmp.lt.u32.totalorder %s844_s15, %s840_s27  ;;  %p848_p8 = scmp.lt.u32.totalorder %s840_s27, %s1119_s26 }
  0x5e   : > { %p842_p11 = pnand %p841_p6, %p614_p2 }
  0x5f   : > { %p847_p7 = por %p846_p0, %p845_p13 }
  0x60   : > { %p843_p12 = pneg %p842_p11 }
  0x61   : > { %p849_p9 = por %p848_p8, %p847_p7 }
  0x63   : > { %p850_p10 = pnand %p849_p9, %p843_p12 }
  0x65   : > { %853 = shalt.err (!%p850_p10)
}
  0x66   : > { %s854_s12 = scalar_lea.vmem %s1121_s9, %s1108_s10  ;;  %s944_s11 = smov [#allocation2]  }
  0x67   : > { %p855_p1 = scmp.ne.s32.totalorder %s1121_s9, %s854_s12  ;;  %s858_s28 = sshll.u32 %s944_s11, 4  ;;  %s859_s28 = int_to_ptr.vmem [resolvable:$false] %s858_s28 }
  0x68   : > { %s860_s23 = scalar_lea.vmem %s859_s28, 512  ;;  %p861_p6 = scmp.lt.s32.totalorder %s1121_s9, %s859_s28 }
  0x69   : > { %p856_p3 = pnand %p855_p1, %p614_p2  ;;  %p862_p11 = scmp.lt.s32.totalorder %s860_s23, %s854_s12 }
  0x6b   : > { %p857_p5 = pneg %p856_p3  ;;  %p863_p13 = por %p862_p11, %p861_p6 }
  0x6d   : > { %p864_p0 = pnand %p863_p13, %p857_p5 }
  0x6f   : > { %867 = shalt.err (!%p864_p0)
}
  0x70   : > { %s945_s25 = smov 128   ;;  %s946_s27 = smov 8  }
  0x71   : > { %231 = dma.hbm_to_vmem [thread:$0]  (%p614_p2), %s1119_s26, %s1108_s10, %s1121_s9, %s1111_s8, %s945_s25, %s945_s25, %s946_s27  }
  0x72 PF: > { %p1262_p12 = scmp.ne.s32.totalorder %s1259_s7, 0 }
  0x73   : > { %s1151_s13 = sand.u32 (!%p1262_p12), 1, %s930_s19   ;;  %p1263_p7 = scmp.ne.s32.totalorder (!%p1262_p12), %s1256_s29, 0 }
  0x74   : > { %237 = sbr.rel (%p1262_p12) target bundleno = 608 (0x260), region = 40  ;;  %s619_s14 = sshll.u32 (!%p1262_p12), %s1151_s13, 4 }
  0x75   : > { %s240_s15 = scalar_lea.sflag (!%p1262_p12), [#allocation3], %s1151_s13  ;;  %s1157_s16 = scalar_lea.vmem (!%p1262_p12), [#allocation2], %s619_s14 }
  0x7b   : > { %913 = dma.done.wait (%p1263_p7), %s240_s15, 256  }
  0x7c   : > { %915 = vsyncadd (%p1263_p7), %s240_s15, 4294967040  ;;  %p1264_p2 = scmp.eq.s32.totalorder %s1001_s22, 0 }
  0x7e   : > { %917 = dma.done.wait (%p1264_p2), [#allocation6], 1792   ;;  %p1265_p8 = pmov %p1264_p2 }
  0x7f   : > { %v290_v0 = vld [vmem:[#allocation5] sm:$0xff]  ;;  %v291_v1 = vld [vmem:[#allocation5 + $0x8] sm:$0xff]  ;;  %v292_v2 = vld [vmem:[#allocation5 + $0x10] sm:$0xff]  ;;  %vm304_vm0 = vcmask 408576   ;;  %vm311_vm1 = vcmask 1041408   ;;  %s277_s26 = scalar_lea.vmem [#allocation8], %s619_s14 }
  0x80   : > { %919 = vsyncadd (%p1265_p8), [#allocation6], 4294965504  ;;  %v694_v3 = vpack.c.bf16 %v291_v1, %v290_v0  ;;  %v293_v4 = vld [vmem:[#allocation5 + $0x18] sm:$0xff]  ;;  %v294_v6 = vld [vmem:[#allocation5 + $0x20] sm:$0xff]  ;;  %s495_s9 = scalar_lea.sflag [#allocation4], %s1151_s13  ;;  %p1266_p9 = scmp.ne.s32.totalorder %s1257_s30, 0 }
  0x81   : > { %v698_v5 = vpack.c.bf16 %v293_v4, %v292_v2  ;;  %v295_v7 = vld [vmem:[#allocation5 + $0x28] sm:$0xff]  ;;  %v288_v8 = vld [vmem:[%s1157_s16] sm:$0xff]  ;;  %v392_v9 = vld [vmem:[#allocation7] sm:$0xff]  ;;  %s632_s17 = sshll.u32 (%p1266_p9), %s1001_s22, 1 }
  0x82   : > { %695 = vmatprep.subr.bf16.mxu0 %v694_v3  ;;  %674 = vmatprep.mubr.msk.f32.mxu0 %vm304_vm0, %v288_v8  ;;  %v393_v10 = vld [vmem:[#allocation7 + $0x8] sm:$0xff]  ;;  %v394_v11 = vld [vmem:[#allocation7 + $0x10] sm:$0xff]  ;;  %v395_v13 = vld [vmem:[#allocation7 + $0x18] sm:$0xff]  ;;  %v702_v14 = vpack.c.bf16 %v295_v7, %v294_v6  ;;  %s503_s12 = ssub.s32 (%p1266_p9), 3, %s632_s17 }
  0x83   : > { %697 = vmatpush3.bf16.msra.mxu0 %v694_v3  ;;  %v706_v12 = vpack.c.bf16 %v393_v10, %v392_v9  ;;  %v710_v15 = vpack.c.bf16 %v395_v13, %v394_v11  ;;  %v296_v16 = vld [vmem:[#allocation5 + $0x30] sm:$0x3]  ;;  %v289_v17 = vld [vmem:[%s1157_s16 + $0x8] sm:$0xff]  ;;  %v397_v19 = vld [vmem:[#allocation7 + $0x28] sm:$0xff]  ;;  %p504_p10 = scmp.lt.s32.totalorder (%p1266_p9), %s503_s12, 2 }
  0x84   : > { %699 = vmatprep.subr.bf16.mxu0 %v698_v5  ;;  %v396_v18 = vld [vmem:[#allocation7 + $0x20] sm:$0xff]  ;;  %v398_v21 = vld [vmem:[#allocation7 + $0x30] sm:$0x3]  ;;  %v623_v22 = vld [vmem:[%s1247_s2] ss:$0 sm:$0xff] }
  0x85   : > { %707 = vmatprep.subr.bf16.mxu1 %v706_v12  ;;  %v714_v20 = vpack.c.bf16 %v397_v19, %v396_v18  ;;  %v627_v29 = vld [vmem:[%s1249_s4] ss:$0 sm:$0xff] }
  0x86   : > { %709 = vmatpush3.bf16.msra.mxu1 %v706_v12 }
  0x87   : > { %701 = vmatpush3.bf16.msra.mxu0 %v698_v5  ;;  %711 = vmatprep.subr.bf16.mxu1 %v710_v15 }
  0x88   : > { %703 = vmatprep.subr.bf16.mxu0 %v702_v14 }
  0x8a   : > { %713 = vmatpush3.bf16.msra.mxu1 %v710_v15 }
  0x8b   : > { %705 = vmatpush3.bf16.msra.mxu0 %v702_v14  ;;  %715 = vmatprep.subr.bf16.mxu1 %v714_v20 }
  0x8c   : > { %672 = vmatprep.subr.msk.mxu0 %vm311_vm1, %v296_v16 }
  0x8e   : > { %717 = vmatpush3.bf16.msra.mxu1 %v714_v20 }
  0x8f   : > { %673 = vmatpush3.msk.msra.mxu0 %vm311_vm1, %v296_v16  ;;  %689 = vmatprep.subr.msk.mxu1 %vm311_vm1, %v398_v21 }
  0x90   : > { %675 = vmatmul.mubr.msk.f32.vlgmr.msra.gmra.mrb[0].mxu0 %vm304_vm0, %v289_v17 }
  0x92   : > { %690 = vmatpush3.msk.msra.mxu1 %vm311_vm1, %v398_v21 }
 0x163   : > { %v676_v23 = vpop.f32.mrb[0].mxu0 }
 0x164   : > { %v387_v24 = vadd.f32 %v676_v23, %v623_v22  ;;  %v381_v25 = vpop.f32.mrb[1].mxu0 }
 0x165   : > { %v382_v26 = vadd.f32 %v623_v22, %v381_v25 }
 0x166   : > { %v391_v28 = vmax.f32 %v387_v24, 0.0 }
 0x167   : > { %v390_v27 = vmax.f32 %v382_v26, 0.0 }
 0x169   : > { %691 = vmatprep.mubr.msk.f32.mxu1 %vm304_vm0, %v390_v27 }
 0x16a   : > { %692 = vmatmul.mubr.msk.f32.vlgmr.msra.gmra.mrb[0].mxu1 %vm304_vm0, %v391_v28 }
 0x23d   : > { %v693_v30 = vpop.f32.mrb[0].mxu1  ;;  %501 = sbr.rel (!%p1266_p9) target bundleno = 608 (0x260), region = 56 }
 0x23e   : > { %v487_v31 = vadd.f32 %v693_v30, %v627_v29  ;;  %v481_v32 = vpop.f32.mrb[1].mxu1 }
 0x23f   : > { %v482_v33 = vadd.f32 %v627_v29, %v481_v32 }
 0x240   : > { %v491_v34 = vadd.f32 %v487_v31, %v289_v17 }
 0x241   : > { %v490_v35 = vadd.f32 %v482_v33, %v288_v8 }
 0x242   : > { %493 = vst.msk [vmem:[%s277_s26 + $0x8] sm:$0xff] %vm304_vm0, %v491_v34 }
 0x243   : > { %492 = vst.msk [vmem:[%s277_s26] sm:$0xff] %vm304_vm0, %v490_v35 }
 0x244   : > { %s1276_s12 = smov (!%p504_p10, %s503_s12), 2 }
 0x245   : > { %s1187_s11 = sshll.u32 %s1276_s12, 7 }
 0x246   : > { %s508_s28 = ssub.s32 256, %s1187_s11 }
 0x247   : > { %509 = vsyncadd %s495_s9, %s508_s28  ;;  %p634_p1 = scmp.ne.s32.totalorder %s1187_s11, 0  ;;  %s641_s23 = sshll.u32 %s1001_s22, 8 }
 0x248   : > { %s1197_s27 = scalar_lea.hbm %s1250_s5, %s641_s23  ;;  %s514_s14 = sshll.u32 %s277_s26, 4  ;;  %s1199_s14 = int_to_ptr.vmem [resolvable:$true] %s514_s14 }
 0x249   : > { %s868_s15 = scalar_lea.vmem %s1199_s14, %s1187_s11  ;;  %s947_s16 = smov [#allocation8]  }
 0x24a   : > { %p869_p3 = scmp.ne.s32.totalorder %s1199_s14, %s868_s15  ;;  %s872_s29 = sshll.u32 %s947_s16, 4  ;;  %s873_s29 = int_to_ptr.vmem [resolvable:$false] %s872_s29 }
 0x24b   : > { %s874_s22 = scalar_lea.vmem %s873_s29, 512  ;;  %p875_p11 = scmp.lt.s32.totalorder %s1199_s14, %s873_s29 }
 0x24c   : > { %p870_p5 = pnand %p869_p3, %p634_p1  ;;  %p876_p13 = scmp.lt.s32.totalorder %s874_s22, %s868_s15 }
 0x24e   : > { %p871_p6 = pneg %p870_p5  ;;  %p877_p0 = por %p876_p13, %p875_p11 }
 0x250   : > { %p878_p12 = pnand %p877_p0, %p871_p6 }
 0x252   : > { %881 = shalt.err (!%p878_p12)
}
 0x253   : > { %s882_s7 = scalar_lea.hbm %s1197_s27, %s1187_s11  ;;  %s886_s26 = scalar_lea.hbm %s1250_s5, 384 }
 0x254   : > { %p883_p7 = scmp.ne.s32.totalorder %s1197_s27, %s882_s7  ;;  %p887_p9 = scmp.lt.u32.totalorder %s1197_s27, %s1250_s5 }
 0x255   : > { %p888_p10 = scmp.lt.u32.totalorder %s886_s26, %s882_s7  ;;  %p890_p5 = scmp.lt.u32.totalorder %s882_s7, %s1197_s27 }
 0x256   : > { %p884_p2 = pnand %p883_p7, %p634_p1 }
 0x257   : > { %p889_p3 = por %p888_p10, %p887_p9 }
 0x258   : > { %p885_p8 = pneg %p884_p2 }
 0x259   : > { %p891_p6 = por %p890_p5, %p889_p3 }
 0x25b   : > { %p892_p11 = pnand %p891_p6, %p885_p8 }
 0x25d   : > { %895 = shalt.err (!%p892_p11)
}
 0x25e   : > { %s948_s28 = smov 128   ;;  %s949_s23 = smov 8  }
 0x25f   : > { %520 = dma.vmem_to_hbm [thread:$0]  (%p634_p1), %s1199_s14, %s1187_s11, %s1197_s27, %s495_s9, %s948_s28, %s948_s28, %s949_s23  }
 0x260 PF: > { %s529_s30 = sand.u32 1, %s926_s18   ;;  %p1267_p13 = scmp.ne.s32.totalorder %s1258_s6, 0 }
 0x261   : > { %s530_s25 = scalar_lea.sflag [#allocation4], %s529_s30 }
 0x262   : > { %p736_p0 = pnand %p610_p4, %p1267_p13 }
 0x264   : > { %921 = dma.done.wait (!%p736_p0), %s530_s25, 256  }
 0x265   : > { %923 = vsyncadd (!%p736_p0), %s530_s25, 4294967040  ;;  %s1268_s15 = sld [smem:[#allocation12_spill]]  ;;  %p19_p12 = scmp.ge.s32.totalorder %s1005_s24, 4  }
 0x266   : > { %s1269_s18 = smov %s930_s19  ;;  %s1270_s19 = smov %s934_s20 }
 0x267   : > { %s1272_s21 = smov %s1005_s24  ;;  %21 = sbr.rel (!%p19_p12) target bundleno = 6 (0x6), region = 93 }
 0x26b   : > { %s1271_s20 = smov %s1268_s15 }
 0x26e   :  { %535 = vsyncpa [#allocation3], 1 }
 0x26f   :  { %537 = vsyncpa [#allocation3 + $0x1], 1 }
 0x270   :  { %538 = vsyncpa [#allocation6], 1 }
 0x271   :  { %539 = vsyncpa [#allocation4], 1 }
 0x272   :  { %541 = vsyncpa [#allocation4 + $0x1], 1 }

</bundles_post_ra>
